<compile_context>
chip_gen: v7x
topology: tpu7x:2x2x1
jax: 0.10.0
libtpu: 0.0.40
codegen_flags: <defaults>
</compile_context>

<pallas_src>
import functools
import math

import jax
import jax.numpy as jnp
from jax.experimental import pallas as pl
from jax.experimental.pallas import tpu as pltpu

_TINY = 1e-37  # guard for the all-zero slice (reference: 0/0 -> NaN -> 0)


def _round_up(x, m):
    return (x + m - 1) // m * m


def _dft_operators(ph, pw, dtype):
    """Dense 2-D orthonormal DFT operators for row-major flattened slices.

    Returns (K_re, K_im), each of shape (ph*pw, ph*pw), such that for a row
    vector x with x[h*pw + w] = d[h, w]:
        x @ K_re == Re(fft2(d, norm="ortho")).reshape(-1)
        x @ K_im == Im(fft2(d, norm="ortho")).reshape(-1)
    """
    u = jnp.arange(ph, dtype=jnp.float32)
    v = jnp.arange(pw, dtype=jnp.float32)
    ah = jnp.exp(-2j * math.pi * jnp.outer(u, u) / ph) / math.sqrt(ph)
    aw = jnp.exp(-2j * math.pi * jnp.outer(v, v) / pw) / math.sqrt(pw)
    m = jnp.kron(ah, aw)              # (ph*pw, ph*pw)
    mt = m.T                          # f_row = x_row @ m.T
    return mt.real.astype(dtype), mt.imag.astype(dtype)


def _ffl_kernel(pred_ref, targ_ref, kre_ref, kim_ref, out_ref, *, alpha, log_matrix):
    # (TB, ph*pw) f32 tile of flattened (n, patch, c) spatial slices.
    d = pred_ref[...] - targ_ref[...]
    dm = d.astype(kre_ref.dtype)      # cast only the MXU operand (bf16 fast path)

    # DFT is linear: DFT(pred) - DFT(target) == DFT(pred - target).
    # Two matmuls give the full 2-D spectrum difference of every slice.
    re = jnp.dot(dm, kre_ref[...], preferred_element_type=jnp.float32)
    im = jnp.dot(dm, kim_ref[...], preferred_element_type=jnp.float32)
    dist = re * re + im * im                       # |F_pred - F_targ|^2, (TB, ph*pw)

    # Spectrum weight matrix (f32, VPU/EUP).
    if alpha == 2.0:
        w = dist                                   # sqrt(dist)**2 == dist
    else:
        w = jnp.sqrt(dist)
        if alpha != 1.0:
            w = w ** alpha
    if log_matrix:
        w = jnp.log(w + 1.0)

    # Per-slice (per-row) max normalization.  Clamping the max handles the
    # all-zero slice exactly like the reference's NaN -> 0 path, without a
    # full-tile isnan compare/select pass.
    m = jnp.max(w, axis=-1, keepdims=True)         # (TB, 1)
    w = w * (1.0 / jnp.maximum(m, _TINY))
    w = jnp.clip(w, 0.0, 1.0)

    partial = jnp.sum(w * dist)                    # scalar partial for this chunk
    out_ref[...] = jnp.broadcast_to(partial.reshape(1, 1, 1), (1, 8, 128))


def focal_frequency_loss(pred, target, *, loss_weight=1.0, alpha=1.0,
                         patch_factor=1, ave_spectrum=False, log_matrix=False,
                         batch_matrix=False, mxu_dtype=jnp.bfloat16,
                         slices_per_step=None):
    """Pallas implementation of FocalFrequencyLoss.forward (matrix=None path)."""
    # TODO(synk): batch_matrix=True (normalization by the global max) needs a
    # second pass over all slices; not implemented here.
    assert not batch_matrix, "batch_matrix=True not supported"

    pred = pred.astype(jnp.float32)
    target = target.astype(jnp.float32)
    n, c, h, w = pred.shape
    assert h % patch_factor == 0 and w % patch_factor == 0
    ph, pw = h // patch_factor, w // patch_factor
    phpw = ph * pw
    npatch = patch_factor * patch_factor

    kbytes = 2 * phpw * phpw * jnp.dtype(mxu_dtype).itemsize
    # TODO(synk): large patches need a separable row/column DFT kernel; the dense
    # Kronecker DFT operator would not fit VMEM above this size.
    assert kbytes <= (16 << 20), "patch too large for the dense-DFT-operator kernel"

    if patch_factor == 1:
        p = pred.reshape(n, 1, c, phpw)        # pure reshape, no HBM copy
        t = target.reshape(n, 1, c, phpw)
    else:
        # TODO(synk): fold the patch gather into the BlockSpec index_map
        # (multi-dim grid over NCHW) to avoid this wrapper-side HBM transpose.
        def to_patches(x):
            x = x.reshape(n, c, patch_factor, ph, patch_factor, pw)
            x = x.transpose(0, 2, 4, 1, 3, 5)
            return x.reshape(n, npatch, c, phpw)
        p, t = to_patches(pred), to_patches(target)

    if ave_spectrum:
        # DFT is linear: the minibatch-average spectrum equals the spectrum of
        # the minibatch-average spatial slice.
        p = jnp.mean(p, axis=0, keepdims=True)
        t = jnp.mean(t, axis=0, keepdims=True)

    b_true = p.shape[0] * npatch * c
    p2 = p.reshape(b_true, phpw)
    t2 = t.reshape(b_true, phpw)

    # Slices (rows) per grid step: multiple of 8 sublanes, large enough to
    # amortize per-step pipeline overhead, small enough for VMEM.
    tb = slices_per_step if slices_per_step is not None else min(128, _round_up(b_true, 8))
    tb = max(8, _round_up(tb, 8))
    b_pad = _round_up(b_true, tb)
    if b_pad != b_true:
        # Zero-padded slices contribute exactly 0 to the partial sums.
        p2 = jnp.pad(p2, ((0, b_pad - b_true), (0, 0)))
        t2 = jnp.pad(t2, ((0, b_pad - b_true), (0, 0)))
    num_chunks = b_pad // tb

    kre, kim = _dft_operators(ph, pw, mxu_dtype)

    kernel = functools.partial(_ffl_kernel, alpha=float(alpha),
                               log_matrix=bool(log_matrix))

    in_spec = pl.BlockSpec((tb, phpw), lambda i: (i, 0))
    k_spec = pl.BlockSpec((phpw, phpw), lambda i: (0, 0))   # constant block, stays resident
    out_spec = pl.BlockSpec((1, 8, 128), lambda i: (i, 0, 0))

    vmem_need = 2 * kbytes + 4 * tb * phpw * 4 + (4 << 20)
    vmem_limit = int(min(max(vmem_need, 16 << 20), 44 << 20))

    partials = pl.pallas_call(
        kernel,
        out_shape=jax.ShapeDtypeStruct((num_chunks, 8, 128), jnp.float32),
        grid_spec=pltpu.PrefetchScalarGridSpec(
            num_scalar_prefetch=0,
            grid=(num_chunks,),
            in_specs=[in_spec, in_spec, k_spec, k_spec],
            out_specs=out_spec,
        ),
        compiler_params=pltpu.CompilerParams(
            dimension_semantics=("parallel",),
            vmem_limit_bytes=vmem_limit,
        ),
    )(p2, t2, kre, kim)

    # TODO(synk): the reference detaches the spectrum weight matrix; training
    # parity under jax.grad needs a custom_vjp (forward value is identical).
    total = jnp.sum(partials[:, 0, 0])
    return total * (loss_weight / float(b_true * phpw))


def _reference_ffl(pred, target, *, loss_weight=1.0, alpha=1.0, patch_factor=1,
                   ave_spectrum=False, log_matrix=False):
    """Pure-JAX reference mirroring the PyTorch module (matrix=None path)."""
    pred = pred.astype(jnp.float32)
    target = target.astype(jnp.float32)
    n, c, h, w = pred.shape
    ph, pw = h // patch_factor, w // patch_factor

    def patches(x):
        x = x.reshape(n, c, patch_factor, ph, patch_factor, pw)
        x = x.transpose(0, 2, 4, 1, 3, 5)
        return x.reshape(n, patch_factor * patch_factor, c, ph, pw)

    pf_ = jnp.fft.fft2(patches(pred), norm="ortho")
    tf_ = jnp.fft.fft2(patches(target), norm="ortho")
    if ave_spectrum:
        pf_ = jnp.mean(pf_, axis=0, keepdims=True)
        tf_ = jnp.mean(tf_, axis=0, keepdims=True)
    dr = pf_.real - tf_.real
    di = pf_.imag - tf_.imag
    dist = dr * dr + di * di
    wgt = jnp.sqrt(dist) ** alpha
    if log_matrix:
        wgt = jnp.log(wgt + 1.0)
    wgt = wgt / jnp.max(wgt, axis=(-2, -1), keepdims=True)
    wgt = jnp.where(jnp.isnan(wgt), 0.0, wgt)
    wgt = jnp.clip(wgt, 0.0, 1.0)
    return jnp.mean(wgt * dist) * loss_weight


if __name__ == "__main__":
    key = jax.random.PRNGKey(0)
    k1, k2 = jax.random.split(key)
    pred = jax.random.normal(k1, (2, 4, 16, 16), dtype=jnp.float32)
    target = jax.random.normal(k2, (2, 4, 16, 16), dtype=jnp.float32)

    checks = [
        # (kernel kwargs, reference kwargs, rtol)
        (dict(), dict(), 3e-2),                                   # bf16 MXU fast path
        (dict(mxu_dtype=jnp.float32), dict(), 2e-3),              # f32 MXU, tight check
        (dict(mxu_dtype=jnp.float32, patch_factor=2, log_matrix=True),
         dict(patch_factor=2, log_matrix=True), 2e-3),
        (dict(mxu_dtype=jnp.float32, alpha=2.0), dict(alpha=2.0), 2e-3),
    ]
    for kern_kw, ref_kw, rtol in checks:
        out = jax.block_until_ready(focal_frequency_loss(pred, target, **kern_kw))
        ref = jax.block_until_ready(_reference_ffl(pred, target, **ref_kw))
        if not jnp.allclose(out, ref, rtol=rtol, atol=1e-5):
            raise AssertionError(
                f"mismatch for {kern_kw}: pallas={float(out)} ref={float(ref)}")

    print("KERNEL_OK")
</pallas_src>

<mosaic_0001>
module attributes {stable_mosaic.version = 11 : i64} {
  func.func @_ffl_kernel(%arg0: i32, %arg1: memref<8x256xf32, #tpu.memory_space<vmem>>, %arg2: memref<8x256xf32, #tpu.memory_space<vmem>>, %arg3: memref<256x256xbf16, #tpu.memory_space<vmem>>, %arg4: memref<256x256xbf16, #tpu.memory_space<vmem>>, %arg5: memref<1x8x128xf32, #tpu.memory_space<vmem>>) attributes {dimension_semantics = [#tpu.dimension_semantics<parallel>], iteration_bounds = array<i64: 1>, scalar_prefetch = 0 : i64, scratch_operands = 0 : i64, tpu.core_type = #tpu.core_type<tc>, window_params = [{transform_indices = @transform_0, window_bounds = array<i64: 8, 256>}, {transform_indices = @transform_1, window_bounds = array<i64: 8, 256>}, {pipeline_mode = #tpu.pipeline_mode<synchronous>, transform_indices = @transform_2, window_bounds = array<i64: 256, 256>}, {pipeline_mode = #tpu.pipeline_mode<synchronous>, transform_indices = @transform_3, window_bounds = array<i64: 256, 256>}, {transform_indices = @transform_4, window_bounds = array<i64: 1, 8, 128>}]} {
    %c0 = arith.constant 0 : index
    %c0_0 = arith.constant 0 : index
    %0 = vector.load %arg1[%c0, %c0_0] : memref<8x256xf32, #tpu.memory_space<vmem>>, vector<8x256xf32>
    %c0_1 = arith.constant 0 : index
    %c0_2 = arith.constant 0 : index
    %1 = vector.load %arg2[%c0_1, %c0_2] : memref<8x256xf32, #tpu.memory_space<vmem>>, vector<8x256xf32>
    %2 = arith.subf %0, %1 : vector<8x256xf32>
    %3 = arith.truncf %2 : vector<8x256xf32> to vector<8x256xbf16>
    %c0_3 = arith.constant 0 : index
    %c0_4 = arith.constant 0 : index
    %4 = vector.load %arg3[%c0_3, %c0_4] : memref<256x256xbf16, #tpu.memory_space<vmem>>, vector<256x256xbf16>
    %cst = arith.constant dense<0.000000e+00> : vector<8x256xf32>
    %5 = tpu.matmul %3, %4, %cst {dimension_numbers = #tpu.dot_dimension_numbers<[1], [0], [0], [1], [0, 0, 1, 1], [], []>} : vector<8x256xbf16>, vector<256x256xbf16>, vector<8x256xf32> -> vector<8x256xf32>
    %c0_5 = arith.constant 0 : index
    %c0_6 = arith.constant 0 : index
    %6 = vector.load %arg4[%c0_5, %c0_6] : memref<256x256xbf16, #tpu.memory_space<vmem>>, vector<256x256xbf16>
    %cst_7 = arith.constant dense<0.000000e+00> : vector<8x256xf32>
    %7 = tpu.matmul %3, %6, %cst_7 {dimension_numbers = #tpu.dot_dimension_numbers<[1], [0], [0], [1], [0, 0, 1, 1], [], []>} : vector<8x256xbf16>, vector<256x256xbf16>, vector<8x256xf32> -> vector<8x256xf32>
    %8 = arith.mulf %5, %5 : vector<8x256xf32>
    %9 = arith.mulf %7, %7 : vector<8x256xf32>
    %10 = arith.addf %8, %9 : vector<8x256xf32>
    %11 = math.sqrt %10 : vector<8x256xf32>
    %cst_8 = arith.constant dense<0xFF800000> : vector<8xf32>
    %12 = vector.multi_reduction <maximumf>, %11, %cst_8 [1] : vector<8x256xf32> to vector<8xf32>
    %13 = vector.shape_cast %12 : vector<8xf32> to vector<8x1xf32>
    %cst_9 = arith.constant 9.99999991E-38 : f32
    %14 = vector.broadcast %cst_9 : f32 to vector<8x1xf32>
    %15 = arith.maximumf %13, %14 : vector<8x1xf32>
    %cst_10 = arith.constant 1.000000e+00 : f32
    %16 = vector.broadcast %cst_10 : f32 to vector<8x1xf32>
    %17 = arith.divf %16, %15 : vector<8x1xf32>
    %18 = vector.broadcast %17 : vector<8x1xf32> to vector<8x256xf32>
    %19 = arith.mulf %11, %18 : vector<8x256xf32>
    %cst_11 = arith.constant 0.000000e+00 : f32
    %cst_12 = arith.constant 1.000000e+00 : f32
    %20 = vector.broadcast %cst_11 : f32 to vector<8x256xf32>
    %21 = arith.maximumf %20, %19 : vector<8x256xf32>
    %22 = vector.broadcast %cst_12 : f32 to vector<8x256xf32>
    %23 = arith.minimumf %22, %21 : vector<8x256xf32>
    %24 = arith.mulf %23, %10 : vector<8x256xf32>
    %25 = vector.shape_cast %24 : vector<8x256xf32> to vector<1x8x256xf32>
    %cst_13 = arith.constant dense<0.000000e+00> : vector<1xf32>
    %26 = vector.multi_reduction <add>, %25, %cst_13 [1, 2] : vector<1x8x256xf32> to vector<1xf32>
    %27 = vector.shape_cast %26 : vector<1xf32> to vector<1x1x1xf32>
    %28 = vector.extract %27[0, 0, 0] : f32 from vector<1x1x1xf32>
    %29 = vector.broadcast %28 : f32 to vector<1x1x1xf32>
    %30 = vector.shape_cast %29 : vector<1x1x1xf32> to vector<1x1x1xf32>
    %31 = vector.broadcast %30 : vector<1x1x1xf32> to vector<1x8x128xf32>
    %c0_14 = arith.constant 0 : index
    %c0_15 = arith.constant 0 : index
    %c0_16 = arith.constant 0 : index
    %32 = vector.load %arg5[%c0_14, %c0_15, %c0_16] : memref<1x8x128xf32, #tpu.memory_space<vmem>>, vector<1x8x128xf32>
    tpu.vector_store %arg5[%c0_14, %c0_15, %c0_16], %31 {strides = array<i32>} : memref<1x8x128xf32, #tpu.memory_space<vmem>>, vector<1x8x128xf32>,
    return
  }
  func.func @transform_0(%arg0: i32) -> (i32, i32) {
    %c0_i32 = arith.constant 0 : i32
    %c0_i32_0 = arith.constant 0 : i32
    return %arg0, %c0_i32 : i32, i32
  }
  func.func @transform_1(%arg0: i32) -> (i32, i32) {
    %c0_i32 = arith.constant 0 : i32
    %c0_i32_0 = arith.constant 0 : i32
    return %arg0, %c0_i32 : i32, i32
  }
  func.func @transform_2(%arg0: i32) -> (i32, i32) {
    %c0_i32 = arith.constant 0 : i32
    %c0_i32_0 = arith.constant 0 : i32
    %c0_i32_1 = arith.constant 0 : i32
    return %c0_i32, %c0_i32_0 : i32, i32
  }
  func.func @transform_3(%arg0: i32) -> (i32, i32) {
    %c0_i32 = arith.constant 0 : i32
    %c0_i32_0 = arith.constant 0 : i32
    %c0_i32_1 = arith.constant 0 : i32
    return %c0_i32, %c0_i32_0 : i32, i32
  }
  func.func @transform_4(%arg0: i32) -> (i32, i32, i32) {
    %c0_i32 = arith.constant 0 : i32
    %c0_i32_0 = arith.constant 0 : i32
    %c0_i32_1 = arith.constant 0 : i32
    return %arg0, %c0_i32, %c0_i32_0 : i32, i32, i32
  }
}

</mosaic_0001>

<bundles_post_ra>
// kernel: tpu_custom_call.1
= control target key start
LH: loop header
LB: loop body
LE: loop exit
PB: predicated region body
PF: predicated region fallthrough
CT: control target
= control target key end

     0   :  { %9 = vsyncpa [#allocation3], 0  ;;  %s991_s0 = inlined_call_operand.hbm [shape: f32[8,256], index: 0, kind: input, shape index: {}]   ;;  %s992_s1 = inlined_call_operand.hbm [shape: f32[8,256], index: 1, kind: input, shape index: {}]   ;;  %s993_s2 = inlined_call_operand.hbm [shape: bf16[256,256], index: 2, kind: input, shape index: {}]   ;;  %s994_s3 = inlined_call_operand.hbm [shape: bf16[256,256], index: 3, kind: input, shape index: {}]   ;;  %s995_s4 = inlined_call_operand.hbm [shape: f32[1,8,128], index: 4, kind: output, shape index: {}]  }
   0x1   :  { %10 = vsyncpa [#allocation6], 0 }
   0x2   :  { %11 = vsyncpa [#allocation9], 0 }
   0x3   :  { %12 = vsyncpa [#allocation4], 0  ;;  %s899_s15 = smov [#allocation5]   ;;  %s900_s17 = smov [#allocation2]  }
   0x4   :  { %s29_s16 = sshll.u32 %s899_s15, 4  ;;  %s19_s18 = sshll.u32 %s900_s17, 4  ;;  %s30_s16 = int_to_ptr.vmem [resolvable:$true] %s29_s16  ;;  %s20_s18 = int_to_ptr.vmem [resolvable:$true] %s19_s18 }
   0x5   :  { %s781_s21 = scalar_lea.hbm %s992_s1, 256 }
   0x6   :  { %p782_p0 = scmp.ne.s32.totalorder %s992_s1, %s781_s21  ;;  %p785_p1 = scmp.lt.u32.totalorder %s781_s21, %s992_s1 }
   0x8   :  { %p787_p2 = pnand %p785_p1, %p782_p0 }
   0xa   :  { %790 = shalt.err (!%p787_p2)
}
   0xb   :  { %s791_s26 = scalar_lea.vmem %s30_s16, 256  ;;  %p796_p4 = scmp.lt.s32.totalorder %s30_s16, %s30_s16 }
   0xc   :  { %p792_p3 = scmp.ne.s32.totalorder %s30_s16, %s791_s26  ;;  %p797_p5 = scmp.lt.s32.totalorder %s791_s26, %s791_s26 }
   0xe   :  { %p798_p6 = por %p797_p5, %p796_p4 }
  0x10   :  { %p799_p7 = pnand %p798_p6, %p792_p3 }
  0x12   :  { %802 = shalt.err (!%p799_p7)
}
  0x13   :  { %32 = dma.hbm_to_vmem [thread:$0]  %s992_s1, 256, %s30_s16, [#allocation6]  }
  0x14   :  { %s803_s5 = scalar_lea.hbm %s991_s0, 256 }
  0x15   :  { %p804_p8 = scmp.ne.s32.totalorder %s991_s0, %s803_s5  ;;  %p807_p9 = scmp.lt.u32.totalorder %s803_s5, %s991_s0 }
  0x17   :  { %p809_p10 = pnand %p807_p9, %p804_p8 }
  0x19   :  { %812 = shalt.err (!%p809_p10)
}
  0x1a   :  { %s813_s10 = scalar_lea.vmem %s20_s18, 256  ;;  %p818_p12 = scmp.lt.s32.totalorder %s20_s18, %s20_s18 }
  0x1b   :  { %p814_p11 = scmp.ne.s32.totalorder %s20_s18, %s813_s10  ;;  %p819_p13 = scmp.lt.s32.totalorder %s813_s10, %s813_s10 }
  0x1d   :  { %p820_p0 = por %p819_p13, %p818_p12 }
  0x1f   :  { %p821_p1 = pnand %p820_p0, %p814_p11 }
  0x21   :  { %824 = shalt.err (!%p821_p1)
}
  0x22   :  { %22 = dma.hbm_to_vmem [thread:$0]  %s991_s0, 256, %s20_s18, [#allocation3]  }
  0x23   :  { %s901_s12 = smov [#allocation7]   ;;  %s825_s16 = scalar_lea.hbm %s993_s2, 4096 }
  0x24   :  { %s38_s13 = sshll.u32 %s901_s12, 4  ;;  %p826_p2 = scmp.ne.s32.totalorder %s993_s2, %s825_s16  ;;  %s39_s13 = int_to_ptr.vmem [resolvable:$true] %s38_s13 }
  0x25   :  { %p829_p3 = scmp.lt.u32.totalorder %s825_s16, %s993_s2 }
  0x27   :  { %p831_p4 = pnand %p829_p3, %p826_p2 }
  0x29   :  { %834 = shalt.err (!%p831_p4)
}
  0x2a   :  { %s835_s22 = scalar_lea.vmem %s39_s13, 4096  ;;  %p840_p6 = scmp.lt.s32.totalorder %s39_s13, %s39_s13 }
  0x2b   :  { %p836_p5 = scmp.ne.s32.totalorder %s39_s13, %s835_s22  ;;  %p841_p7 = scmp.lt.s32.totalorder %s835_s22, %s835_s22 }
  0x2d   :  { %p842_p8 = por %p841_p7, %p840_p6 }
  0x2f   :  { %p843_p9 = pnand %p842_p8, %p836_p5 }
  0x31   :  { %846 = shalt.err (!%p843_p9)
}
  0x32   :  { %s902_s0 = smov 128   ;;  %s903_s18 = smov 8  }
  0x33   :  { %44 = dma.hbm_to_vmem [thread:$0]  %s993_s2, 4096, %s39_s13, [#allocation6], %s902_s0, %s902_s0, %s903_s18  }
  0x34   :  { %s904_s25 = smov [#allocation8]   ;;  %s847_s29 = scalar_lea.hbm %s994_s3, 4096 }
  0x35   :  { %s50_s26 = sshll.u32 %s904_s25, 4  ;;  %p848_p10 = scmp.ne.s32.totalorder %s994_s3, %s847_s29  ;;  %s51_s26 = int_to_ptr.vmem [resolvable:$true] %s50_s26 }
  0x36   :  { %p851_p11 = scmp.lt.u32.totalorder %s847_s29, %s994_s3 }
  0x38   :  { %p853_p12 = pnand %p851_p11, %p848_p10 }
  0x3a   :  { %856 = shalt.err (!%p853_p12)
}
  0x3b   :  { %s857_s8 = scalar_lea.vmem %s51_s26, 4096  ;;  %p862_p0 = scmp.lt.s32.totalorder %s51_s26, %s51_s26 }
  0x3c   :  { %p858_p13 = scmp.ne.s32.totalorder %s51_s26, %s857_s8  ;;  %p863_p1 = scmp.lt.s32.totalorder %s857_s8, %s857_s8 }
  0x3e   :  { %p864_p2 = por %p863_p1, %p862_p0 }
  0x40   :  { %p865_p3 = pnand %p864_p2, %p858_p13 }
  0x42   :  { %868 = shalt.err (!%p865_p3)
}
  0x43   :  { %56 = dma.hbm_to_vmem [thread:$0]  %s994_s3, 4096, %s51_s26, [#allocation9], %s902_s0, %s902_s0, %s903_s18  }
  0x44   :  { %891 = dma.done.wait [#allocation3], 256  }
  0x45   :  { %892 = vsyncadd [#allocation3], 4294967040 }
  0x46   :  { %893 = dma.done.wait [#allocation6], 4352  }
  0x47   :  { %894 = vsyncadd [#allocation6], 4294962944 }
  0x48   :  { %895 = dma.done.wait [#allocation9], 4096  }
  0x49   :  { %896 = vsyncadd [#allocation9], 4294963200  ;;  %v679_v0 = vld [vmem:[#allocation7 + $0x4] ss:$8 sps:$4 sm:$0xff]   ;;  %v683_v2 = vld [vmem:[#allocation7] ss:$8 sps:$4 sm:$0xff]  }
  0x4a   :  { %v681_v1 = vld [vmem:[#allocation8 + $0x4] ss:$8 sps:$4 sm:$0xff]   ;;  %269 = vmatprep.subr.bf16.mxu0 %v679_v0  ;;  %v684_v3 = vld [vmem:[#allocation8] ss:$8 sps:$4 sm:$0xff]   ;;  %v685_v4 = vld [vmem:[#allocation7 + $0x14] ss:$8 sps:$4 sm:$0xff]  }
  0x4b   :  { %502 = vmatprep.subr.bf16.mxu1 %v681_v1  ;;  %270 = vmatpush1.bf16.msra.mxu0 %v683_v2  ;;  %v687_v5 = vld [vmem:[#allocation8 + $0x14] ss:$8 sps:$4 sm:$0xff]   ;;  %v689_v6 = vld [vmem:[#allocation7 + $0x10] ss:$8 sps:$4 sm:$0xff]   ;;  %v691_v8 = vld [vmem:[#allocation7 + $0x24] ss:$8 sps:$4 sm:$0xff]  }
  0x4c   :  { %503 = vmatpush1.bf16.msra.mxu1 %v684_v3  ;;  %271 = vmatprep.subr.bf16.mxu0 %v685_v4  ;;  %v690_v7 = vld [vmem:[#allocation8 + $0x10] ss:$8 sps:$4 sm:$0xff]   ;;  %v693_v9 = vld [vmem:[#allocation8 + $0x24] ss:$8 sps:$4 sm:$0xff]   ;;  %v695_v10 = vld [vmem:[#allocation7 + $0x20] ss:$8 sps:$4 sm:$0xff]  }
  0x4d   :  { %504 = vmatprep.subr.bf16.mxu1 %v687_v5  ;;  %v696_v11 = vld [vmem:[#allocation8 + $0x20] ss:$8 sps:$4 sm:$0xff]   ;;  %v697_v12 = vld [vmem:[#allocation7 + $0x34] ss:$8 sps:$4 sm:$0xff]   ;;  %v701_v14 = vld [vmem:[#allocation7 + $0x30] ss:$8 sps:$4 sm:$0xff]  }
  0x4e   :  { %v699_v13 = vld [vmem:[#allocation8 + $0x34] ss:$8 sps:$4 sm:$0xff]   ;;  %v702_v15 = vld [vmem:[#allocation8 + $0x30] ss:$8 sps:$4 sm:$0xff]   ;;  %v703_v16 = vld [vmem:[#allocation7 + $0x44] ss:$8 sps:$4 sm:$0xff]  }
  0x4f   :  { %272 = vmatpush1.bf16.msra.mxu0 %v689_v6  ;;  %v705_v17 = vld [vmem:[#allocation8 + $0x44] ss:$8 sps:$4 sm:$0xff]   ;;  %v707_v18 = vld [vmem:[#allocation7 + $0x40] ss:$8 sps:$4 sm:$0xff]   ;;  %v709_v20 = vld [vmem:[#allocation7 + $0x54] ss:$8 sps:$4 sm:$0xff]  }
  0x50   :  { %505 = vmatpush1.bf16.msra.mxu1 %v690_v7  ;;  %273 = vmatprep.subr.bf16.mxu0 %v691_v8  ;;  %v708_v19 = vld [vmem:[#allocation8 + $0x40] ss:$8 sps:$4 sm:$0xff]   ;;  %v711_v21 = vld [vmem:[#allocation8 + $0x54] ss:$8 sps:$4 sm:$0xff]   ;;  %v713_v22 = vld [vmem:[#allocation7 + $0x50] ss:$8 sps:$4 sm:$0xff]  }
  0x51   :  { %506 = vmatprep.subr.bf16.mxu1 %v693_v9  ;;  %v714_v23 = vld [vmem:[#allocation8 + $0x50] ss:$8 sps:$4 sm:$0xff]   ;;  %v715_v24 = vld [vmem:[#allocation7 + $0x64] ss:$8 sps:$4 sm:$0xff]   ;;  %v719_v26 = vld [vmem:[#allocation7 + $0x60] ss:$8 sps:$4 sm:$0xff]  }
  0x52   :  { %v717_v25 = vld [vmem:[#allocation8 + $0x64] ss:$8 sps:$4 sm:$0xff]   ;;  %v720_v27 = vld [vmem:[#allocation8 + $0x60] ss:$8 sps:$4 sm:$0xff]   ;;  %v721_v28 = vld [vmem:[#allocation7 + $0x74] ss:$8 sps:$4 sm:$0xff]  }
  0x53   :  { %274 = vmatpush1.bf16.msra.mxu0 %v695_v10  ;;  %v723_v29 = vld [vmem:[#allocation8 + $0x74] ss:$8 sps:$4 sm:$0xff]   ;;  %v725_v30 = vld [vmem:[#allocation7 + $0x70] ss:$8 sps:$4 sm:$0xff]   ;;  %v727_v32 = vld [vmem:[#allocation7 + $0x84] ss:$8 sps:$4 sm:$0xff]  }
  0x54   :  { %507 = vmatpush1.bf16.msra.mxu1 %v696_v11  ;;  %275 = vmatprep.subr.bf16.mxu0 %v697_v12  ;;  %v726_v31 = vld [vmem:[#allocation8 + $0x70] ss:$8 sps:$4 sm:$0xff]   ;;  %v729_v33 = vld [vmem:[#allocation8 + $0x84] ss:$8 sps:$4 sm:$0xff]   ;;  %v731_v34 = vld [vmem:[#allocation7 + $0x80] ss:$8 sps:$4 sm:$0xff]  }
  0x55   :  { %508 = vmatprep.subr.bf16.mxu1 %v699_v13  ;;  %v732_v35 = vld [vmem:[#allocation8 + $0x80] ss:$8 sps:$4 sm:$0xff]   ;;  %v733_v36 = vld [vmem:[#allocation7 + $0x94] ss:$8 sps:$4 sm:$0xff]   ;;  %v737_v38 = vld [vmem:[#allocation7 + $0x90] ss:$8 sps:$4 sm:$0xff]  }
  0x56   :  { %v735_v37 = vld [vmem:[#allocation8 + $0x94] ss:$8 sps:$4 sm:$0xff]   ;;  %v738_v39 = vld [vmem:[#allocation8 + $0x90] ss:$8 sps:$4 sm:$0xff]   ;;  %v739_v40 = vld [vmem:[#allocation7 + $0xa4] ss:$8 sps:$4 sm:$0xff]  }
  0x57   :  { %276 = vmatpush1.bf16.msra.mxu0 %v701_v14  ;;  %v741_v41 = vld [vmem:[#allocation8 + $0xa4] ss:$8 sps:$4 sm:$0xff]   ;;  %v743_v42 = vld [vmem:[#allocation7 + $0xa0] ss:$8 sps:$4 sm:$0xff]   ;;  %v745_v44 = vld [vmem:[#allocation7 + $0xb4] ss:$8 sps:$4 sm:$0xff]  }
  0x58   :  { %509 = vmatpush1.bf16.msra.mxu1 %v702_v15  ;;  %277 = vmatprep.subr.bf16.mxu0 %v703_v16  ;;  %v744_v43 = vld [vmem:[#allocation8 + $0xa0] ss:$8 sps:$4 sm:$0xff]   ;;  %v747_v45 = vld [vmem:[#allocation8 + $0xb4] ss:$8 sps:$4 sm:$0xff]   ;;  %v749_v48 = vld [vmem:[#allocation7 + $0xb0] ss:$8 sps:$4 sm:$0xff]  }
  0x59   :  { %510 = vmatprep.subr.bf16.mxu1 %v705_v17  ;;  %v70_v46 = vld [vmem:[#allocation2 + $0x8] sm:$0xff]  ;;  %v72_v47 = vld [vmem:[#allocation5 + $0x8] sm:$0xff]  ;;  %v69_v0 = vld [vmem:[#allocation2] sm:$0xff]  ;;  %s905_s3 = smov [#allocation10]  }
  0x5a   :  { %v750_v49 = vld [vmem:[#allocation8 + $0xb0] ss:$8 sps:$4 sm:$0xff]   ;;  %v74_v50 = vsub.f32 %v70_v46, %v72_v47  ;;  %v751_v51 = vld [vmem:[#allocation7 + $0xc4] ss:$8 sps:$4 sm:$0xff]   ;;  %v755_v54 = vld [vmem:[#allocation7 + $0xc0] ss:$8 sps:$4 sm:$0xff]  }
  0x5b   :  { %278 = vmatpush1.bf16.msra.mxu0 %v707_v18  ;;  %v753_v52 = vld [vmem:[#allocation8 + $0xc4] ss:$8 sps:$4 sm:$0xff]   ;;  %v756_v55 = vld [vmem:[#allocation8 + $0xc0] ss:$8 sps:$4 sm:$0xff]   ;;  %v757_v56 = vld [vmem:[#allocation7 + $0xd4] ss:$8 sps:$4 sm:$0xff]  }
  0x5c   :  { %511 = vmatpush1.bf16.msra.mxu1 %v708_v19  ;;  %279 = vmatprep.subr.bf16.mxu0 %v709_v20  ;;  %v76_v53 = vpack.c.bf16 %v74_v50, %v74_v50  ;;  %v759_v57 = vld [vmem:[#allocation8 + $0xd4] ss:$8 sps:$4 sm:$0xff]   ;;  %v761_v58 = vld [vmem:[#allocation7 + $0xd0] ss:$8 sps:$4 sm:$0xff]   ;;  %v763_v60 = vld [vmem:[#allocation7 + $0xe4] ss:$8 sps:$4 sm:$0xff]  }
  0x5d   :  { %512 = vmatprep.subr.bf16.mxu1 %v711_v21  ;;  %v762_v59 = vld [vmem:[#allocation8 + $0xd0] ss:$8 sps:$4 sm:$0xff]   ;;  %v765_v61 = vld [vmem:[#allocation8 + $0xe4] ss:$8 sps:$4 sm:$0xff]   ;;  %v767_v62 = vld [vmem:[#allocation7 + $0xe0] ss:$8 sps:$4 sm:$0xff]  }
  0x5e   :  { %301 = vmatprep.mubr.bf16.mxu0 %v76_v53  ;;  %534 = vmatprep.mubr.bf16.mxu1 %v76_v53  ;;  %v768_v63 = vld [vmem:[#allocation8 + $0xe0] ss:$8 sps:$4 sm:$0xff]   ;;  %v71_v1 = vld [vmem:[#allocation5] sm:$0xff]  ;;  %s595_s10 = sshll.u32 %s905_s3, 4  ;;  %s596_s10 = int_to_ptr.vmem [resolvable:$true] %s595_s10 }
  0x5f   :  { %280 = vmatpush1.bf16.msra.mxu0 %v713_v22  ;;  %v769_v2 = vld [vmem:[#allocation7 + $0xf4] ss:$8 sps:$4 sm:$0xff]   ;;  %v73_v4 = vsub.f32 %v69_v0, %v71_v1  ;;  %v773_v5 = vld [vmem:[#allocation7 + $0xf0] ss:$8 sps:$4 sm:$0xff]   ;;  %s869_s11 = scalar_lea.vmem %s596_s10, 128  ;;  %p874_p5 = scmp.lt.s32.totalorder %s596_s10, %s596_s10 }
  0x60   :  { %513 = vmatpush1.bf16.msra.mxu1 %v714_v23  ;;  %281 = vmatprep.subr.bf16.mxu0 %v715_v24  ;;  %v771_v3 = vld [vmem:[#allocation8 + $0xf4] ss:$8 sps:$4 sm:$0xff]   ;;  %v774_v6 = vld [vmem:[#allocation8 + $0xf0] ss:$8 sps:$4 sm:$0xff]   ;;  %p870_p4 = scmp.ne.s32.totalorder %s596_s10, %s869_s11  ;;  %p875_p6 = scmp.lt.s32.totalorder %s869_s11, %s869_s11 }
  0x61   :  { %514 = vmatprep.subr.bf16.mxu1 %v717_v25  ;;  %v75_v7 = vpack.c.bf16 %v73_v4, %v73_v4 }
  0x62   :  { %p876_p7 = por %p875_p6, %p874_p5 }
  0x63   :  { %282 = vmatpush1.bf16.msra.mxu0 %v719_v26 }
  0x64   :  { %515 = vmatpush1.bf16.msra.mxu1 %v720_v27  ;;  %283 = vmatprep.subr.bf16.mxu0 %v721_v28  ;;  %p877_p8 = pnand %p876_p7, %p870_p4 }
  0x65   :  { %516 = vmatprep.subr.bf16.mxu1 %v723_v29 }
  0x67   :  { %284 = vmatpush1.bf16.msra.mxu0 %v725_v30 }
  0x68   :  { %517 = vmatpush1.bf16.msra.mxu1 %v726_v31  ;;  %285 = vmatprep.subr.bf16.mxu0 %v727_v32 }
  0x69   :  { %518 = vmatprep.subr.bf16.mxu1 %v729_v33 }
  0x6b   :  { %286 = vmatpush1.bf16.msra.mxu0 %v731_v34 }
  0x6c   :  { %519 = vmatpush1.bf16.msra.mxu1 %v732_v35  ;;  %287 = vmatprep.subr.bf16.mxu0 %v733_v36 }
  0x6d   :  { %520 = vmatprep.subr.bf16.mxu1 %v735_v37 }
  0x6f   :  { %288 = vmatpush1.bf16.msra.mxu0 %v737_v38 }
  0x70   :  { %521 = vmatpush1.bf16.msra.mxu1 %v738_v39  ;;  %289 = vmatprep.subr.bf16.mxu0 %v739_v40 }
  0x71   :  { %522 = vmatprep.subr.bf16.mxu1 %v741_v41 }
  0x73   :  { %290 = vmatpush1.bf16.msra.mxu0 %v743_v42 }
  0x74   :  { %523 = vmatpush1.bf16.msra.mxu1 %v744_v43  ;;  %291 = vmatprep.subr.bf16.mxu0 %v745_v44 }
  0x75   :  { %524 = vmatprep.subr.bf16.mxu1 %v747_v45 }
  0x77   :  { %292 = vmatpush1.bf16.msra.mxu0 %v749_v48 }
  0x78   :  { %525 = vmatpush1.bf16.msra.mxu1 %v750_v49  ;;  %293 = vmatprep.subr.bf16.mxu0 %v751_v51 }
  0x79   :  { %526 = vmatprep.subr.bf16.mxu1 %v753_v52 }
  0x7b   :  { %294 = vmatpush1.bf16.msra.mxu0 %v755_v54 }
  0x7c   :  { %527 = vmatpush1.bf16.msra.mxu1 %v756_v55  ;;  %295 = vmatprep.subr.bf16.mxu0 %v757_v56 }
  0x7d   :  { %528 = vmatprep.subr.bf16.mxu1 %v759_v57 }
  0x7f   :  { %296 = vmatpush1.bf16.msra.mxu0 %v761_v58 }
  0x80   :  { %529 = vmatpush1.bf16.msra.mxu1 %v762_v59  ;;  %297 = vmatprep.subr.bf16.mxu0 %v763_v60 }
  0x81   :  { %530 = vmatprep.subr.bf16.mxu1 %v765_v61 }
  0x83   :  { %298 = vmatpush1.bf16.msra.mxu0 %v767_v62 }
  0x84   :  { %531 = vmatpush1.bf16.msra.mxu1 %v768_v63  ;;  %299 = vmatprep.subr.bf16.mxu0 %v769_v2 }
  0x85   :  { %532 = vmatprep.subr.bf16.mxu1 %v771_v3 }
  0x87   :  { %300 = vmatpush1.bf16.msra.mxu0 %v773_v5 }
  0x88   :  { %533 = vmatpush1.bf16.msra.mxu1 %v774_v6 }
  0x8a   :  { %302 = vmatmul.mubr.bf16.vlgmr.msra.gmra.mrb[0].mxu0 %v75_v7 }
  0x8b   :  { %535 = vmatmul.mubr.bf16.vlgmr.msra.gmra.mrb[0].mxu1 %v75_v7 }
 0x15d   :  { %v303_v8 = vpop.f32.mrb[0].mxu0 }
 0x15e   :  { %v536_v9 = vpop.f32.mrb[0].mxu1  ;;  %v543_v10 = vmul.f32 %v303_v8, %v303_v8  ;;  %v305_v12 = vpop.f32.mrb[1].mxu0 }
 0x15f   :  { %v545_v11 = vmul.f32 %v536_v9, %v536_v9  ;;  %v538_v13 = vpop.f32.mrb[1].mxu1  ;;  %v544_v14 = vmul.f32 %v305_v12, %v305_v12  ;;  %v307_v16 = vpop.f32.mrb[2].mxu0 }
 0x160   :  { %v546_v15 = vmul.f32 %v538_v13, %v538_v13  ;;  %v540_v17 = vpop.f32.mrb[2].mxu1  ;;  %v308_v19 = vpop.f32.mrb[3].mxu0 }
 0x161   :  { %v547_v18 = vadd.f32 %v545_v11, %v543_v10  ;;  %v541_v20 = vpop.f32.mrb[3].mxu1 }
 0x162   :  { %v548_v21 = vadd.f32 %v546_v15, %v544_v14 }
 0x163   :  { %775 = vrsqrt.f32 %v547_v18  ;;  %vm551_vm0 = vcmp.eq.f32.partialorder %v547_v18, inf  ;;  %v554_v25 = vand.u32 2147483648, %v547_v18  ;;  %vm553_vm1 = vcmp.eq.f32.partialorder %v547_v18, 0.0 }
 0x164   :  { %777 = vrsqrt.f32 %v548_v21  ;;  %vm558_vm2 = vcmp.eq.f32.partialorder %v548_v21, inf  ;;  %v561_v28 = vand.u32 2147483648, %v548_v21  ;;  %vm560_vm3 = vcmp.eq.f32.partialorder %v548_v21, 0.0 }
 0x16d   :  { %v776_v22 = vpop.eup %775 }
 0x16e   :  { %v778_v23 = vpop.eup %777  ;;  %v550_v24 = vmul.f32 %v776_v22, %v547_v18 }
 0x16f   :  { %v557_v26 = vmul.f32 %v778_v23, %v548_v21 }
 0x170   :  { %v552_v27 = vsel %vm551_vm0, %v547_v18, %v550_v24 }
 0x171   :  { %v555_v29 = vsel %vm553_vm1, %v554_v25, %v552_v27  ;;  %v559_v30 = vsel %vm558_vm2, %v548_v21, %v557_v26 }
 0x172   :  { %v562_v31 = vsel %vm560_vm3, %v561_v28, %v559_v30 }
 0x173   :  { %v563_v32 = vmax.f32 %v555_v29, %v562_v31 }
 0x175   :  { %564 = vmax.xlane.f32.xlu0 %v563_v32 }
 0x202   :  { %v565_v33 = vpop.xlane.xlu0 %564 }
 0x203   :  { %v566_v34 = vmax.f32 %v565_v33, 1e-37 }
 0x205   :  { %779 = vrcp.f32 %v566_v34 }
 0x20f   :  { %v780_v35 = vpop.eup %779 }
 0x210   :  { %v569_v36 = vmul.f32 %v780_v35, %v555_v29  ;;  %v570_v37 = vmul.f32 %v780_v35, %v562_v31 }
 0x212   :  { %v571_v38 = vmax.f32 %v569_v36, 0.0  ;;  %v572_v39 = vmax.f32 %v570_v37, 0.0 }
 0x214   :  { %v573_v40 = vmin.f32 %v571_v38, 1.0  ;;  %v574_v41 = vmin.f32 %v572_v39, 1.0 }
 0x216   :  { %v575_v42 = vmul.f32 %v573_v40, %v547_v18  ;;  %v576_v43 = vmul.f32 %v574_v41, %v548_v21 }
 0x218   :  { %v577_v44 = vadd.f32 %v576_v43, %v575_v42 }
 0x21a   :  { %578 = vadd.xlane.f32.xlu0 %v577_v44 }
 0x2a7   :  { %v579_v45 = vpop.xlane.xlu0 %578 }
 0x2a8   :  { %v580_v46 = vrot.slane %v579_v45, 4 }
 0x2aa   :  { %v581_v47 = vadd.f32 %v580_v46, %v579_v45 }
 0x2ac   :  { %v582_v48 = vrot.slane %v581_v47, 2 }
 0x2ae   :  { %v583_v49 = vadd.f32 %v582_v48, %v581_v47 }
 0x2b0   :  { %v584_v50 = vrot.slane %v583_v49, 1 }
 0x2b2   :  { %v585_v51 = vadd.f32 %v584_v50, %v583_v49 }
 0x2b4   :  { %670 = vpush %v585_v51 }
 0x2e5   :  { %s671_s1 = spop %670 }
 0x2e6   :  { %v587_v52 = vstv %s671_s1 }
 0x2e7   :  { %588 = vst [vmem:[#allocation10] sm:$0xff] %v587_v52 }
 0x2e8   :  { %880 = shalt.err (!%p877_p8)
}
 0x2e9   :  { %s881_s14 = scalar_lea.hbm %s995_s4, 128 }
 0x2ea   :  { %p882_p9 = scmp.ne.s32.totalorder %s995_s4, %s881_s14  ;;  %p885_p10 = scmp.lt.u32.totalorder %s881_s14, %s995_s4 }
 0x2ec   :  { %p887_p11 = pnand %p885_p10, %p882_p9 }
 0x2ee   :  { %890 = shalt.err (!%p887_p11)
}
 0x2ef   :  { %598 = dma.vmem_to_hbm [thread:$0]  %s596_s10, 128, %s995_s4, [#allocation4]  }
 0x2f0   :  { %897 = dma.done.wait [#allocation4], 128  }
 0x2f1   :  { %898 = vsyncadd [#allocation4], 4294967168 }
 0x2f2   :  { %602 = vsyncpa [#allocation3], 1 }
 0x2f3   :  { %603 = vsyncpa [#allocation6], 1 }
 0x2f4   :  { %604 = vsyncpa [#allocation9], 1 }
 0x2f5   :  { %605 = vsyncpa [#allocation4], 1 }

</bundles_post_ra>
